<compile_context>
chip_gen: v5e
topology: v5e:2x2
jax: 0.10.0
libtpu: 0.0.40
codegen_flags: <defaults>
</compile_context>

<pallas_src>
import functools
import math

import jax
import jax.numpy as jnp
from jax import lax
from jax.experimental import pallas as pl
from jax.experimental.pallas import tpu as pltpu


_BN_EPS = 1e-5
_BN_SCALE = float(1.0 / math.sqrt(1.0 + _BN_EPS))


def _round_up(x, m):
    return ((x + m - 1) // m) * m


# ------------------------------------------------------------------
# Pallas kernels
# ------------------------------------------------------------------

@functools.lru_cache(maxsize=None)
def _make_matmul_kernel(act, bn):
    """Tiled MXU matmul with fused bias + BatchNorm scale + activation epilogue."""
    scale = _BN_SCALE if bn else None

    def kernel(a_ref, b_ref, bias_ref, o_ref, acc_ref):
        @pl.when(pl.program_id(2) == 0)
        def _():
            acc_ref[...] = jnp.zeros_like(acc_ref)

        acc_ref[...] += jnp.dot(a_ref[...], b_ref[...],
                                preferred_element_type=jnp.float32)

        @pl.when(pl.program_id(2) == pl.num_programs(2) - 1)
        def _():
            r = acc_ref[...] + bias_ref[...]
            if scale is not None:
                r = r * scale
            if act == 'relu':
                r = jnp.maximum(r, 0.0)
            elif act == 'lrelu':
                r = jnp.where(r >= 0.0, r, 0.2 * r)
            elif act == 'sigmoid':
                r = 1.0 / (1.0 + jnp.exp(-r))
            elif act == 'tanh':
                r = jnp.tanh(r)
            o_ref[...] = r.astype(o_ref.dtype)

    return kernel


def _tiles(M, K, N):
    # M: sublane-granular (8); single block up to 1024 rows (no 128-padding).
    if M <= 1024:
        tm = Mp = _round_up(M, 8)
    else:
        tm, Mp = 512, _round_up(M, 512)
    # K: single full-extent block (no padding) whenever it fits comfortably.
    if K <= 2048:
        tk = Kp = K
    else:
        tk, Kp = 1024, _round_up(K, 1024)
    # N: full-extent block for small channel counts, 256-wide tiles otherwise.
    if N <= 256:
        tn = Np = N
    else:
        tn, Np = 256, _round_up(N, 256)
    return tm, Mp, tk, Kp, tn, Np


@functools.partial(jax.jit, static_argnames=('act', 'bn'))
def _pallas_matmul(a, b, bias, act=None, bn=False):
    M, K = a.shape
    _, N = b.shape
    tm, Mp, tk, Kp, tn, Np = _tiles(M, K, N)

    # bf16 MXU operands, f32 accumulation + epilogue.
    a_p = a.astype(jnp.bfloat16)
    b_p = b.astype(jnp.bfloat16)
    if (Mp, Kp) != (M, K):
        a_p = jnp.pad(a_p, ((0, Mp - M), (0, Kp - K)))
    if (Kp, Np) != (K, N):
        b_p = jnp.pad(b_p, ((0, Kp - K), (0, Np - N)))
    bias_p = bias.astype(jnp.float32)
    if Np != N:
        bias_p = jnp.pad(bias_p, (0, Np - N))
    bias_p = bias_p.reshape(1, Np)

    out = pl.pallas_call(
        _make_matmul_kernel(act, bn),
        out_shape=jax.ShapeDtypeStruct((Mp, Np), jnp.float32),
        grid_spec=pltpu.PrefetchScalarGridSpec(
            num_scalar_prefetch=0,
            grid=(Mp // tm, Np // tn, Kp // tk),
            in_specs=[pl.BlockSpec((tm, tk), lambda i, j, k: (i, k)),
                      pl.BlockSpec((tk, tn), lambda i, j, k: (k, j)),
                      pl.BlockSpec((1, tn), lambda i, j, k: (0, j))],
            out_specs=pl.BlockSpec((tm, tn), lambda i, j, k: (i, j)),
            scratch_shapes=[pltpu.VMEM((tm, tn), jnp.float32)]),
        compiler_params=pltpu.CompilerParams(
            dimension_semantics=("parallel", "parallel", "arbitrary"),
            vmem_limit_bytes=32 * 1024 * 1024),
    )(a_p, b_p, bias_p)
    if (Mp, Np) != (M, N):
        out = out[:M, :N]
    return out


def pallas_matmul(a, b, bias, act=None, bn=False):
    if bias is None:
        bias = jnp.zeros((b.shape[1],), jnp.float32)
    return _pallas_matmul(a, b, bias, act=act, bn=bn)


def _softmax_disp_kernel(x_ref, o_ref):
    x = x_ref[...]                                   # (D, tc)  softmax over axis 0
    m = jnp.max(x, axis=0, keepdims=True)
    e = jnp.exp(x - m)
    s = jnp.sum(e, axis=0, keepdims=True)
    idx = lax.broadcasted_iota(jnp.float32, x.shape, 0)
    num = jnp.sum(e * idx, axis=0, keepdims=True)    # (1, tc)  -> lane-dense store
    o_ref[...] = num * pl.reciprocal(s, approx=True)


def softmax_disparity_regression(cost, maxdisp):
    # cost: [B, D, H, W]; softmax over D then expectation of disparity index.
    B, D, H, W = cost.shape
    assert D == maxdisp
    rows = B * H * W
    xt = cost.transpose(1, 0, 2, 3).reshape(D, rows)   # disparity axis on sublanes
    tc = min(1024, _round_up(rows, 128))
    Rp = _round_up(rows, tc)
    if Rp != rows:
        xt = jnp.pad(xt, ((0, 0), (0, Rp - rows)))
    out = pl.pallas_call(
        _softmax_disp_kernel,
        out_shape=jax.ShapeDtypeStruct((1, Rp), jnp.float32),
        grid_spec=pltpu.PrefetchScalarGridSpec(
            num_scalar_prefetch=0,
            grid=(Rp // tc,),
            in_specs=[pl.BlockSpec((D, tc), lambda i: (0, i))],
            out_specs=pl.BlockSpec((1, tc), lambda i: (0, i))),
        compiler_params=pltpu.CompilerParams(
            dimension_semantics=("parallel",)),
    )(xt)
    return out[0, :rows].reshape(B, H, W)


# ------------------------------------------------------------------
# Conv helpers (im2col glue in plain JAX, matmul + epilogue in Pallas)
# ------------------------------------------------------------------

_ACT = {
    None: lambda v: v,
    'relu': lambda v: jnp.maximum(v, 0.0),
    'lrelu': lambda v: jnp.where(v >= 0.0, v, 0.2 * v),
}


def relu(x):
    return jnp.maximum(x, 0.0)


def _im2col2d(x, kh, kw, stride, padding):
    # TODO(synk): im2col kept as XLA glue; a fully fused Pallas index_map-based
    # gather would remove the inflated intermediate entirely.
    N, C, H, W = x.shape
    if padding:
        x = jnp.pad(x, ((0, 0), (0, 0), (padding, padding), (padding, padding)))
    Ho = (H + 2 * padding - kh) // stride + 1
    Wo = (W + 2 * padding - kw) // stride + 1
    taps = [x[:, :, i:i + stride * Ho:stride, j:j + stride * Wo:stride]
            for i in range(kh) for j in range(kw)]
    col = jnp.stack(taps, axis=-1)                       # (N, C, Ho, Wo, kh*kw)
    A = col.transpose(0, 2, 3, 1, 4).reshape(N * Ho * Wo, C * kh * kw)
    return A, Ho, Wo


def _im2col3d(x, k, stride, padding):
    N, C, D, H, W = x.shape
    if padding:
        x = jnp.pad(x, ((0, 0), (0, 0), (padding, padding),
                        (padding, padding), (padding, padding)))
    Do = (D + 2 * padding - k) // stride + 1
    Ho = (H + 2 * padding - k) // stride + 1
    Wo = (W + 2 * padding - k) // stride + 1
    taps = [x[:, :, a:a + stride * Do:stride, b:b + stride * Ho:stride,
              c:c + stride * Wo:stride]
            for a in range(k) for b in range(k) for c in range(k)]
    col = jnp.stack(taps, axis=-1)                       # (N, C, Do, Ho, Wo, k^3)
    A = col.transpose(0, 2, 3, 4, 1, 5).reshape(N * Do * Ho * Wo, C * k ** 3)
    return A, Do, Ho, Wo


def conv2d(x, p, stride=1, padding=0, pre_act=None, bn=False, act=None):
    w, b = p['w'], p['b']
    Co, Ci, kh, kw = w.shape
    x = _ACT[pre_act](x)
    N = x.shape[0]
    A, Ho, Wo = _im2col2d(x, kh, kw, stride, padding)
    Bm = w.reshape(Co, Ci * kh * kw).T
    out = pallas_matmul(A, Bm, b, act=act, bn=bn)
    return out.reshape(N, Ho, Wo, Co).transpose(0, 3, 1, 2)


def conv3d(x, p, stride=1, padding=1, pre_act=None, bn=False, act=None):
    w, b = p['w'], p['b']
    Co, Ci, k = w.shape[0], w.shape[1], w.shape[2]
    x = _ACT[pre_act](x)
    N = x.shape[0]
    A, Do, Ho, Wo = _im2col3d(x, k, stride, padding)
    Bm = w.reshape(Co, Ci * k ** 3).T
    out = pallas_matmul(A, Bm, b, act=act, bn=bn)
    return out.reshape(N, Do, Ho, Wo, Co).transpose(0, 4, 1, 2, 3)


def conv_transpose2d(x, p, pre_act=None, bn=False, act=None):
    """Sub-pixel decomposition of ConvTranspose2d(k=4, stride=2, padding=1).

    Each of the 4 output phases is a 2x2 valid correlation of the (1,1)-padded
    input with a 2x2 sub-kernel -> one matmul with K = Ci*4 (vs Ci*16 on a 4x
    larger zero-dilated input); no structural zeros reach the MXU.
    """
    w, b = p['w'], p['b']                      # PyTorch layout [Ci, Co, 4, 4]
    Ci, Co, kh, kw = w.shape
    assert (kh, kw) == (4, 4)
    x = _ACT[pre_act](x)
    N, _, H, W = x.shape
    xp = jnp.pad(x, ((0, 0), (0, 0), (1, 1), (1, 1)))
    A, Ho, Wo = _im2col2d(xp, 2, 2, 1, 0)                 # (N*(H+1)*(W+1), Ci*4)
    taps = ([3, 1], [2, 0])                               # even / odd output phase
    subs = []
    for a in (0, 1):
        for c in (0, 1):
            ws = w[:, :, taps[a], :][:, :, :, taps[c]]    # (Ci, Co, 2, 2)
            subs.append(ws.transpose(0, 2, 3, 1).reshape(Ci * 4, Co))
    Bm = jnp.concatenate(subs, axis=1)                    # (Ci*4, 4*Co)
    bias = None if b is None else jnp.tile(b, 4)
    out = pallas_matmul(A, Bm, bias, act=act, bn=bn)      # (N*(H+1)*(W+1), 4*Co)
    val = out.reshape(N, H + 1, W + 1, 4, Co)
    rows = []
    for a in (0, 1):
        cols = [val[:, a:a + H, c:c + W, a * 2 + c, :] for c in (0, 1)]
        rows.append(jnp.stack(cols, axis=3))              # (N, H, W, 2, Co)
    y = jnp.stack(rows, axis=2)                           # (N, H, 2, W, 2, Co)
    return y.reshape(N, 2 * H, 2 * W, Co).transpose(0, 3, 1, 2)


def conv_transpose3d(x, p, pre_act=None, bn=False, act=None):
    """Sub-pixel decomposition of ConvTranspose3d(k=3, s=2, p=1, output_padding=1).

    All 8 output phases read the same 2x2x2 windows of the end-padded input ->
    one matmul with K = Ci*8 (vs Ci*27 on an 8x larger zero-dilated input).
    """
    w, b = p['w'], p['b']                      # PyTorch layout [Ci, Co, 3, 3, 3]
    Ci, Co, k = w.shape[0], w.shape[1], w.shape[2]
    assert k == 3
    x = _ACT[pre_act](x)
    N, _, D, H, W = x.shape
    xp = jnp.pad(x, ((0, 0), (0, 0), (0, 1), (0, 1), (0, 1)))
    A, Do, Ho, Wo = _im2col3d(xp, 2, 1, 0)                # (N*D*H*W, Ci*8)
    wext = jnp.pad(w, ((0, 0), (0, 0), (0, 1), (0, 1), (0, 1)))   # zero slot at 3
    taps = ([1, 3], [2, 0])                               # even / odd output phase
    subs = []
    for a in (0, 1):
        for bb in (0, 1):
            for c in (0, 1):
                ws = wext[:, :, taps[a], :, :][:, :, :, taps[bb], :][:, :, :, :, taps[c]]
                subs.append(ws.transpose(0, 2, 3, 4, 1).reshape(Ci * 8, Co))
    Bm = jnp.concatenate(subs, axis=1)                    # (Ci*8, 8*Co)
    bias = None if b is None else jnp.tile(b, 8)
    out = pallas_matmul(A, Bm, bias, act=act, bn=bn)      # (N*D*H*W, 8*Co)
    val = out.reshape(N, D, H, W, 2, 2, 2, Co)
    return val.transpose(0, 7, 1, 4, 2, 5, 3, 6).reshape(N, Co, 2 * D, 2 * H, 2 * W)


# ------------------------------------------------------------------
# Parameter initialization (deterministic, synthetic)
# ------------------------------------------------------------------

class _Keys:
    def __init__(self, key):
        self._k = key

    def __call__(self):
        self._k, sub = jax.random.split(self._k)
        return sub


def _w(kg, shape, scale=0.05):
    return scale * jax.random.normal(kg(), shape, dtype=jnp.float32)


def conv2d_params(kg, ci, co, k, bias):
    return {'w': _w(kg, (co, ci, k, k)), 'b': _w(kg, (co,)) if bias else None}


def convt2d_params(kg, ci, co, k, bias):
    return {'w': _w(kg, (ci, co, k, k)), 'b': _w(kg, (co,)) if bias else None}


def conv3d_params(kg, ci, co, k, bias=False):
    return {'w': _w(kg, (co, ci, k, k, k)),
            'b': _w(kg, (co,)) if bias else None}


def convt3d_params(kg, ci, co, k, bias=False):
    return {'w': _w(kg, (ci, co, k, k, k)),
            'b': _w(kg, (co,)) if bias else None}


def init_params(key, input_nc=3, output_nc=3, ngf=32):
    kg = _Keys(key)
    P = {}
    # norm_layer = BatchNorm2d -> use_bias = False wherever it is consulted.
    P['outerencoder'] = conv2d_params(kg, input_nc, ngf, 4, False)
    P['down2ngf'] = conv2d_params(kg, ngf, ngf * 2, 4, False)
    P['down4ngf'] = conv2d_params(kg, ngf * 2, ngf * 4, 4, False)
    P['down8ngf'] = conv2d_params(kg, ngf * 4, ngf * 8, 4, False)
    # inner_blocks: single innermost UnetSkipConnectionBlock (num_downs=5)
    P['inner_down'] = conv2d_params(kg, ngf * 8, ngf * 8, 4, False)
    P['inner_up'] = convt2d_params(kg, ngf * 8, ngf * 8, 4, False)
    P['up4ngf'] = convt2d_params(kg, ngf * 8 * 3, ngf * 4, 4, False)
    P['up4ngfr'] = convt2d_params(kg, ngf * 8 * 3, ngf * 4, 4, False)
    P['up2ngf'] = convt2d_params(kg, ngf * 4 * 3, ngf * 2, 4, False)
    P['up2ngfr'] = convt2d_params(kg, ngf * 4 * 3, ngf * 2, 4, False)
    P['upngf'] = conv2d_params(kg, ngf * 2 * 3, ngf, 3, False)
    P['upngfr'] = conv2d_params(kg, ngf * 2 * 3, ngf, 3, False)
    P['upngf2img'] = convt2d_params(kg, ngf * 2 * 3, ngf, 4, False)
    P['upngf2imgr'] = convt2d_params(kg, ngf * 2 * 3, ngf, 4, False)
    P['outerdecode'] = convt2d_params(kg, ngf * 1 * 3, ngf, 4, False)
    P['outerdecoder'] = convt2d_params(kg, ngf * 1 * 3, ngf, 4, False)

    def resnet_stack(dim):
        return [{'c1': conv2d_params(kg, dim, dim, 3, True),   # nn.Conv2d default bias
                 'c2': conv2d_params(kg, dim, dim, 3, True)} for _ in range(4)]

    P['toimg_blocks'] = resnet_stack(ngf + 3)
    P['toimg_final'] = conv2d_params(kg, ngf + 3, output_nc, 3, False)
    P['toimgr_blocks'] = resnet_stack(ngf + 3)
    P['toimgr_final'] = conv2d_params(kg, ngf + 3, output_nc, 3, False)

    # 3D cost aggregation (PSMNet-style, convbn_3d conv has bias=False)
    P['dres0'] = [conv3d_params(kg, 64, 32, 3), conv3d_params(kg, 32, 32, 3)]
    P['dres1'] = [conv3d_params(kg, 32, 32, 3), conv3d_params(kg, 32, 32, 3)]

    def hourglass_params(inpl=32):
        return {'c1': conv3d_params(kg, inpl, inpl * 2, 3),
                'c2': conv3d_params(kg, inpl * 2, inpl * 2, 3),
                'c3': conv3d_params(kg, inpl * 2, inpl * 2, 3),
                'c4': conv3d_params(kg, inpl * 2, inpl * 2, 3),
                'c5': convt3d_params(kg, inpl * 2, inpl * 2, 3),
                'c6': convt3d_params(kg, inpl * 2, inpl, 3)}

    P['dres2'] = hourglass_params()
    P['dres3'] = hourglass_params()
    P['dres4'] = hourglass_params()

    def classif_params():
        return [conv3d_params(kg, 32, 32, 3), conv3d_params(kg, 32, 1, 3)]

    P['classif1'] = classif_params()
    P['classif2'] = classif_params()
    P['classif3'] = classif_params()
    return P


# ------------------------------------------------------------------
# Forward pass (eval mode)
# ------------------------------------------------------------------

def resnet_block(x, p):
    h = conv2d(x, p['c1'], 1, 1, bn=True, act='relu')
    h = conv2d(h, p['c2'], 1, 1, bn=True)
    return x + h


def convbn3d(x, p, stride, pre_act=None, act=None):
    return conv3d(x, p, stride, 1, pre_act=pre_act, bn=True, act=act)


def hourglass_fwd(p, x, presqu, postsqu):
    out = convbn3d(x, p['c1'], 2, act='relu')
    pre = convbn3d(out, p['c2'], 1)
    if postsqu is not None:
        pre = relu(pre + postsqu)
    else:
        pre = relu(pre)
    out = convbn3d(pre, p['c3'], 2, act='relu')
    out = convbn3d(out, p['c4'], 1, act='relu')
    c5 = conv_transpose3d(out, p['c5'], bn=True)
    if presqu is not None:
        post = relu(c5 + presqu)
    else:
        post = relu(c5 + pre)
    out = conv_transpose3d(post, p['c6'], bn=True)
    return out, pre, post


def stereo_unet_forward(P, x, y, ngf=32, maxdisp=192):
    cat = lambda ts: jnp.concatenate(ts, axis=1)

    # ---- shared-weight encoder + innermost U-block: batch left/right together
    xy = jnp.concatenate([x, y], axis=0)
    f1 = conv2d(xy, P['outerencoder'], 2, 1)
    f2 = conv2d(f1, P['down2ngf'], 2, 1, pre_act='lrelu', bn=True)
    f3 = conv2d(f2, P['down4ngf'], 2, 1, pre_act='lrelu', bn=True)
    f4 = conv2d(f3, P['down8ngf'], 2, 1, pre_act='lrelu', bn=True)
    h = conv2d(f4, P['inner_down'], 2, 1, pre_act='lrelu')
    d8 = conv_transpose2d(h, P['inner_up'], pre_act='relu', bn=True)

    nb = x.shape[0]
    feat1, yfeat1 = f1[:nb], f1[nb:]
    feat2, yfeat2 = f2[:nb], f2[nb:]
    feat4, yfeat4 = f3[:nb], f3[nb:]
    feat8, yfeat8 = f4[:nb], f4[nb:]
    dec8, ydec8 = d8[:nb], d8[nb:]

    xmix8 = cat([feat8, dec8, ydec8])
    ymix8 = cat([yfeat8, dec8, ydec8])
    xdec4 = conv_transpose2d(xmix8, P['up4ngf'], pre_act='relu', bn=True)
    ydec4 = conv_transpose2d(ymix8, P['up4ngfr'], pre_act='relu', bn=True)
    xmix4 = cat([feat4, xdec4, ydec4])
    ymix4 = cat([yfeat4, xdec4, ydec4])
    xdec2 = conv_transpose2d(xmix4, P['up2ngf'], pre_act='relu', bn=True)
    ydec2 = conv_transpose2d(ymix4, P['up2ngfr'], pre_act='relu', bn=True)
    xmix2 = cat([feat2, xdec2, ydec2])
    ymix2 = cat([yfeat2, xdec2, ydec2])
    xdec1 = conv_transpose2d(xmix2, P['upngf2img'], pre_act='relu', bn=True)
    ydec1 = conv_transpose2d(ymix2, P['upngf2imgr'], pre_act='relu', bn=True)
    xmix1 = cat([feat1, xdec1, ydec1])
    ymix1 = cat([yfeat1, xdec1, ydec1])
    xout = conv_transpose2d(xmix1, P['outerdecode'], pre_act='relu', bn=True)
    yout = conv_transpose2d(ymix1, P['outerdecoder'], pre_act='relu', bn=True)

    ximg = cat([x, xout])
    for blk in P['toimg_blocks']:
        ximg = resnet_block(ximg, blk)
    ximg = conv2d(ximg, P['toimg_final'], 1, 1, act='sigmoid')
    yimg = cat([y, yout])
    for blk in P['toimgr_blocks']:
        yimg = resnet_block(yimg, blk)
    yimg = conv2d(yimg, P['toimgr_final'], 1, 1, act='tanh')

    outputs = {'xout': ximg, 'yout': yimg}

    # ---------- stereo cost volume (vectorized construction) ----------
    refimg_fea = conv2d(xmix2, P['upngf'], 1, 1, pre_act='relu', bn=True)
    targetimg_fea = conv2d(ymix2, P['upngfr'], 1, 1, pre_act='relu', bn=True)

    B, C, Hc, Wc = refimg_fea.shape
    D4 = maxdisp // 4
    di = jnp.arange(D4)
    wi = jnp.arange(Wc)
    mask = (wi[None, :] >= di[:, None]).astype(refimg_fea.dtype)      # (D4, Wc)
    ref_part = refimg_fea[:, :, None, :, :] * mask[None, None, :, None, :]
    shift = jnp.clip(wi[None, :] - di[:, None], 0, Wc - 1)            # (D4, Wc)
    tgt = jnp.take(targetimg_fea, shift, axis=3)                      # (B,C,Hc,D4,Wc)
    tgt_part = tgt.transpose(0, 1, 3, 2, 4) * mask[None, None, :, None, :]
    cost = jnp.concatenate([ref_part, tgt_part], axis=1)              # (B,2C,D4,Hc,Wc)

    cost0 = convbn3d(cost, P['dres0'][0], 1, act='relu')
    cost0 = convbn3d(cost0, P['dres0'][1], 1, act='relu')
    tmp = convbn3d(cost0, P['dres1'][0], 1, act='relu')
    cost0 = convbn3d(tmp, P['dres1'][1], 1) + cost0

    out1, pre1, post1 = hourglass_fwd(P['dres2'], cost0, None, None)
    out1 = out1 + cost0
    out2, pre2, post2 = hourglass_fwd(P['dres3'], out1, pre1, post1)
    out2 = out2 + cost0
    out3, pre3, post3 = hourglass_fwd(P['dres4'], out2, pre1, post2)
    out3 = out3 + cost0

    def classif(p, z):
        hh = convbn3d(z, p[0], 1, act='relu')
        return conv3d(hh, p[1], 1, 1)

    cost1 = classif(P['classif1'], out1)
    cost2 = classif(P['classif2'], out2) + cost1
    cost3 = classif(P['classif3'], out3) + cost2
    # TODO(synk): training-only outputs (depthl_2ngf / depthl_ngf) omitted —
    # this implements the eval-mode forward (self.training == False).

    Hx, Wx = x.shape[2], x.shape[3]
    # Trilinear upsample (half-pixel / align_corners=False convention).
    cost3_up = jax.image.resize(cost3, (B, 1, maxdisp, Hx, Wx),
                                method='trilinear')
    cost3_up = jnp.squeeze(cost3_up, axis=1)
    outputs['depthl'] = softmax_disparity_regression(cost3_up, maxdisp)
    return outputs


# ------------------------------------------------------------------
# Main
# ------------------------------------------------------------------

if __name__ == "__main__":
    key = jax.random.PRNGKey(0)
    pkey, xkey, ykey = jax.random.split(key, 3)

    # ngf = 32 is required by the hard-coded 64-channel cost volume (dres0).
    params = init_params(pkey, input_nc=3, output_nc=3, ngf=32)

    x = jax.random.normal(xkey, (1, 3, 32, 32), dtype=jnp.float32)
    y = jax.random.normal(ykey, (1, 3, 32, 32), dtype=jnp.float32)

    fwd = jax.jit(stereo_unet_forward)
    outs = fwd(params, x, y)
    outs = jax.block_until_ready(outs)

    assert outs['xout'].shape == (1, 3, 32, 32)
    assert outs['yout'].shape == (1, 3, 32, 32)
    assert outs['depthl'].shape == (1, 32, 32)
    assert all(bool(jnp.all(jnp.isfinite(v))) for v in outs.values())
    print("KERNEL_OK")
</pallas_src>

<mosaic_0001>
module attributes {stable_mosaic.version = 11 : i64} {
  func.func @kernel(%arg0: i32, %arg1: i32, %arg2: i32, %arg3: memref<512x48xbf16, #tpu.memory_space<vmem>>, %arg4: memref<48x32xbf16, #tpu.memory_space<vmem>>, %arg5: memref<1x32xf32, #tpu.memory_space<vmem>>, %arg6: memref<512x32xf32, #tpu.memory_space<vmem>>, %arg7: memref<512x32xf32, #tpu.memory_space<vmem>>) attributes {dimension_semantics = [#tpu.dimension_semantics<parallel>, #tpu.dimension_semantics<parallel>, #tpu.dimension_semantics<arbitrary>], iteration_bounds = array<i64: 1, 1, 1>, scalar_prefetch = 0 : i64, scratch_operands = 1 : i64, tpu.core_type = #tpu.core_type<tc>, window_params = [{transform_indices = @transform_0, window_bounds = array<i64: 512, 48>}, {transform_indices = @transform_1, window_bounds = array<i64: 48, 32>}, {transform_indices = @transform_2, window_bounds = array<i64: 1, 32>}, {transform_indices = @transform_3, window_bounds = array<i64: 512, 32>}]} {
    %c0_i32 = arith.constant 0 : i32
    %0 = arith.cmpi eq, %arg2, %c0_i32 : i32
    %1 = arith.extui %0 : i1 to i32
    %c0_i32_0 = arith.constant 0 : i32
    %2 = arith.cmpi ne, %1, %c0_i32_0 : i32
    scf.if %2 {
      %cst_10 = arith.constant 0.000000e+00 : f32
      %12 = vector.broadcast %cst_10 : f32 to vector<512x32xf32>
      %c0_11 = arith.constant 0 : index
      %c0_12 = arith.constant 0 : index
      %13 = vector.load %arg7[%c0_11, %c0_12] : memref<512x32xf32, #tpu.memory_space<vmem>>, vector<512x32xf32>
      tpu.vector_store %arg7[%c0_11, %c0_12], %12 {strides = array<i32>} : memref<512x32xf32, #tpu.memory_space<vmem>>, vector<512x32xf32>,
    } else {
    }
    %c0 = arith.constant 0 : index
    %c0_1 = arith.constant 0 : index
    %3 = vector.load %arg7[%c0, %c0_1] : memref<512x32xf32, #tpu.memory_space<vmem>>, vector<512x32xf32>
    %c0_2 = arith.constant 0 : index
    %c0_3 = arith.constant 0 : index
    %4 = vector.load %arg3[%c0_2, %c0_3] : memref<512x48xbf16, #tpu.memory_space<vmem>>, vector<512x48xbf16>
    %c0_4 = arith.constant 0 : index
    %c0_5 = arith.constant 0 : index
    %5 = vector.load %arg4[%c0_4, %c0_5] : memref<48x32xbf16, #tpu.memory_space<vmem>>, vector<48x32xbf16>
    %cst = arith.constant dense<0.000000e+00> : vector<512x32xf32>
    %6 = tpu.matmul %4, %5, %cst {dimension_numbers = #tpu.dot_dimension_numbers<[1], [0], [0], [1], [0, 0, 1, 1], [], []>} : vector<512x48xbf16>, vector<48x32xbf16>, vector<512x32xf32> -> vector<512x32xf32>
    %7 = arith.addf %3, %6 : vector<512x32xf32>
    %c0_6 = arith.constant 0 : index
    %c0_7 = arith.constant 0 : index
    %8 = vector.load %arg7[%c0_6, %c0_7] : memref<512x32xf32, #tpu.memory_space<vmem>>, vector<512x32xf32>
    tpu.vector_store %arg7[%c0_6, %c0_7], %7 {strides = array<i32>} : memref<512x32xf32, #tpu.memory_space<vmem>>, vector<512x32xf32>,
    %c0_i32_8 = arith.constant 0 : i32
    %9 = arith.cmpi eq, %arg2, %c0_i32_8 : i32
    %10 = arith.extui %9 : i1 to i32
    %c0_i32_9 = arith.constant 0 : i32
    %11 = arith.cmpi ne, %10, %c0_i32_9 : i32
    scf.if %11 {
      %c0_10 = arith.constant 0 : index
      %c0_11 = arith.constant 0 : index
      %12 = vector.load %arg7[%c0_10, %c0_11] : memref<512x32xf32, #tpu.memory_space<vmem>>, vector<512x32xf32>
      %c0_12 = arith.constant 0 : index
      %c0_13 = arith.constant 0 : index
      %13 = vector.load %arg5[%c0_12, %c0_13] : memref<1x32xf32, #tpu.memory_space<vmem>>, vector<1x32xf32>
      %14 = vector.broadcast %13 : vector<1x32xf32> to vector<512x32xf32>
      %15 = arith.addf %12, %14 : vector<512x32xf32>
      %c0_14 = arith.constant 0 : index
      %c0_15 = arith.constant 0 : index
      %16 = vector.load %arg6[%c0_14, %c0_15] : memref<512x32xf32, #tpu.memory_space<vmem>>, vector<512x32xf32>
      tpu.vector_store %arg6[%c0_14, %c0_15], %15 {strides = array<i32>} : memref<512x32xf32, #tpu.memory_space<vmem>>, vector<512x32xf32>,
    } else {
    }
    return
  }
  func.func @transform_0(%arg0: i32, %arg1: i32, %arg2: i32) -> (i32, i32) {
    %c0_i32 = arith.constant 0 : i32
    return %arg0, %arg2 : i32, i32
  }
  func.func @transform_1(%arg0: i32, %arg1: i32, %arg2: i32) -> (i32, i32) {
    %c0_i32 = arith.constant 0 : i32
    return %arg2, %arg1 : i32, i32
  }
  func.func @transform_2(%arg0: i32, %arg1: i32, %arg2: i32) -> (i32, i32) {
    %c0_i32 = arith.constant 0 : i32
    %c0_i32_0 = arith.constant 0 : i32
    return %c0_i32, %arg1 : i32, i32
  }
  func.func @transform_3(%arg0: i32, %arg1: i32, %arg2: i32) -> (i32, i32) {
    %c0_i32 = arith.constant 0 : i32
    return %arg0, %arg1 : i32, i32
  }
}

</mosaic_0001>

<bundles_post_ra>
// kernel: _pallas_matmul.1
= control target key start
LH: loop header
LB: loop body
LE: loop exit
PB: predicated region body
PF: predicated region fallthrough
CT: control target
= control target key end

     0   :  { %vm396_vm0 = vcmask 392192   ;;  %vm19_vm1 = vcmask 261120   ;;  %v1212_v27 = vmov 0.0   ;;  %s1890_s1 = inlined_call_operand.vmem [shape: bf16[48,32], index: 1, kind: input, shape index: {}]   ;;  %s1891_s2 = inlined_call_operand.vmem [shape: f32[1,32], index: 2, kind: input, shape index: {}]   ;;  %s1892_s0 = inlined_call_operand.vmem [shape: bf16[512,48], index: 0, kind: input, shape index: {}]   ;;  %s1893_s3 = inlined_call_operand.vmem [shape: f32[512,32], index: 3, kind: output, shape index: {}]  }
   0x1   :  { %v1200_v0 = vld [vmem:[%s1890_s1 + $0x10] sm:$0xff]  ;;  %v1199_v1 = vld [vmem:[%s1890_s1 + $0x8] sm:$0xff]  ;;  %v1198_v2 = vld [vmem:[%s1890_s1] sm:$0xff]  ;;  %20 = vst.msk [vmem:[#allocation2] sm:$0xff] %vm19_vm1, %v1212_v27 }
   0x2   :  { %498 = vmatpush.bf16.msra.mxu0 %v1200_v0  ;;  %1201 = vmatpush.bf16.msra.mxu1 %v1200_v0  ;;  %v1166_v3 = vld [vmem:[%s1892_s0] sm:$0xff]  ;;  %v1167_v7 = vld [vmem:[%s1892_s0 + $0x8] sm:$0xff]  ;;  %v1168_v11 = vld [vmem:[%s1892_s0 + $0x10] sm:$0xff]  ;;  %21 = vst.msk [vmem:[#allocation2 + $0x8] sm:$0xff] %vm19_vm1, %v1212_v27 }
   0x3   :  { %1202 = vmatpush.bf16.msra.mxu2 %v1200_v0  ;;  %1203 = vmatpush.bf16.msra.mxu3 %v1200_v0  ;;  %v1174_v4 = vld [vmem:[%s1892_s0 + $0x40] sm:$0xff]  ;;  %v1175_v8 = vld [vmem:[%s1892_s0 + $0x48] sm:$0xff]  ;;  %v1176_v12 = vld [vmem:[%s1892_s0 + $0x50] sm:$0xff]  ;;  %22 = vst.msk [vmem:[#allocation2 + $0x10] sm:$0xff] %vm19_vm1, %v1212_v27 }
   0x4   :  { %v1182_v5 = vld [vmem:[%s1892_s0 + $0x80] sm:$0xff]  ;;  %v1183_v9 = vld [vmem:[%s1892_s0 + $0x88] sm:$0xff]  ;;  %v1184_v13 = vld [vmem:[%s1892_s0 + $0x90] sm:$0xff]  ;;  %23 = vst.msk [vmem:[#allocation2 + $0x18] sm:$0xff] %vm19_vm1, %v1212_v27 }
   0x5   :  { %v1190_v6 = vld [vmem:[%s1892_s0 + $0xc0] sm:$0xff]  ;;  %v1191_v10 = vld [vmem:[%s1892_s0 + $0xc8] sm:$0xff]  ;;  %v1192_v14 = vld [vmem:[%s1892_s0 + $0xd0] sm:$0xff]  ;;  %24 = vst.msk [vmem:[#allocation2 + $0x20] sm:$0xff] %vm19_vm1, %v1212_v27 }
   0x6   :  { %499 = vmatpush.bf16.msra.mxu0 %v1199_v1  ;;  %1204 = vmatpush.bf16.msra.mxu1 %v1199_v1  ;;  %v1169_v15 = vld [vmem:[%s1892_s0 + $0x18] sm:$0xff]  ;;  %v1170_v19 = vld [vmem:[%s1892_s0 + $0x20] sm:$0xff]  ;;  %v1171_v23 = vld [vmem:[%s1892_s0 + $0x28] sm:$0xff]  ;;  %25 = vst.msk [vmem:[#allocation2 + $0x28] sm:$0xff] %vm19_vm1, %v1212_v27 }
   0x7   :  { %1205 = vmatpush.bf16.msra.mxu2 %v1199_v1  ;;  %1206 = vmatpush.bf16.msra.mxu3 %v1199_v1  ;;  %v1177_v16 = vld [vmem:[%s1892_s0 + $0x58] sm:$0xff]  ;;  %v1178_v20 = vld [vmem:[%s1892_s0 + $0x60] sm:$0xff]  ;;  %v1179_v24 = vld [vmem:[%s1892_s0 + $0x68] sm:$0xff]  ;;  %26 = vst.msk [vmem:[#allocation2 + $0x30] sm:$0xff] %vm19_vm1, %v1212_v27 }
   0x8   :  { %v1185_v17 = vld [vmem:[%s1892_s0 + $0x98] sm:$0xff]  ;;  %v1186_v21 = vld [vmem:[%s1892_s0 + $0xa0] sm:$0xff]  ;;  %v1187_v25 = vld [vmem:[%s1892_s0 + $0xa8] sm:$0xff]  ;;  %27 = vst.msk [vmem:[#allocation2 + $0x38] sm:$0xff] %vm19_vm1, %v1212_v27 }
   0x9   :  { %v1193_v18 = vld [vmem:[%s1892_s0 + $0xd8] sm:$0xff]  ;;  %v1194_v22 = vld [vmem:[%s1892_s0 + $0xe0] sm:$0xff]  ;;  %v1195_v26 = vld [vmem:[%s1892_s0 + $0xe8] sm:$0xff]  ;;  %28 = vst.msk [vmem:[#allocation2 + $0x40] sm:$0xff] %vm19_vm1, %v1212_v27 }
   0xa   :  { %500 = vmatpush.bf16.msra.mxu0 %v1198_v2  ;;  %1207 = vmatpush.bf16.msra.mxu1 %v1198_v2  ;;  %29 = vst.msk [vmem:[#allocation2 + $0x48] sm:$0xff] %vm19_vm1, %v1212_v27  ;;  %v1172_v28 = vld [vmem:[%s1892_s0 + $0x30] sm:$0xff]  ;;  %v1173_v32 = vld [vmem:[%s1892_s0 + $0x38] sm:$0xff]  ;;  %v84_v36 = vld [vmem:[#allocation2] sm:$0xff] }
   0xb   :  { %1208 = vmatpush.bf16.msra.mxu2 %v1198_v2  ;;  %1209 = vmatpush.bf16.msra.mxu3 %v1198_v2  ;;  %v1180_v29 = vld [vmem:[%s1892_s0 + $0x70] sm:$0xff]  ;;  %30 = vst.msk [vmem:[#allocation2 + $0x50] sm:$0xff] %vm19_vm1, %v1212_v27  ;;  %v1181_v33 = vld [vmem:[%s1892_s0 + $0x78] sm:$0xff]  ;;  %v1472_v40 = vld [vmem:[%s1891_s2] ss:$0 sm:$0xff] }
   0xc   :  { %v1188_v30 = vld [vmem:[%s1892_s0 + $0xb0] sm:$0xff]  ;;  %31 = vst.msk [vmem:[#allocation2 + $0x58] sm:$0xff] %vm19_vm1, %v1212_v27  ;;  %v1189_v34 = vld [vmem:[%s1892_s0 + $0xb8] sm:$0xff]  ;;  %v85_v55 = vld [vmem:[#allocation2 + $0x8] sm:$0xff] }
   0xd   :  { %1134 = vmatmul.msk.bf16.vlgmr.msra.gmra.mxu0 %vm396_vm0, %v1166_v3  ;;  %1142 = vmatmul.msk.bf16.vlgmr.msra.gmra.mxu1 %vm396_vm0, %v1174_v4  ;;  %v1196_v31 = vld [vmem:[%s1892_s0 + $0xf0] sm:$0xff]  ;;  %32 = vst.msk [vmem:[#allocation2 + $0x60] sm:$0xff] %vm19_vm1, %v1212_v27  ;;  %v1197_v35 = vld [vmem:[%s1892_s0 + $0xf8] sm:$0xff] }
   0xe   :  { %1150 = vmatmul.msk.bf16.vlgmr.msra.gmra.mxu2 %vm396_vm0, %v1182_v5  ;;  %1158 = vmatmul.msk.bf16.vlgmr.msra.gmra.mxu3 %vm396_vm0, %v1190_v6  ;;  %33 = vst.msk [vmem:[#allocation2 + $0x68] sm:$0xff] %vm19_vm1, %v1212_v27  ;;  %v86_v63 = vld [vmem:[#allocation2 + $0x10] sm:$0xff] }
   0xf   :  { %34 = vst.msk [vmem:[#allocation2 + $0x70] sm:$0xff] %vm19_vm1, %v1212_v27 }
  0x10   :  { %35 = vst.msk [vmem:[#allocation2 + $0x78] sm:$0xff] %vm19_vm1, %v1212_v27 }
  0x11   :  { %36 = vst.msk [vmem:[#allocation2 + $0x80] sm:$0xff] %vm19_vm1, %v1212_v27 }
  0x12   :  { %37 = vst.msk [vmem:[#allocation2 + $0x88] sm:$0xff] %vm19_vm1, %v1212_v27 }
  0x13   :  { %38 = vst.msk [vmem:[#allocation2 + $0x90] sm:$0xff] %vm19_vm1, %v1212_v27 }
  0x14   :  { %39 = vst.msk [vmem:[#allocation2 + $0x98] sm:$0xff] %vm19_vm1, %v1212_v27 }
  0x15   :  { %40 = vst.msk [vmem:[#allocation2 + $0xa0] sm:$0xff] %vm19_vm1, %v1212_v27 }
  0x16   :  { %41 = vst.msk [vmem:[#allocation2 + $0xa8] sm:$0xff] %vm19_vm1, %v1212_v27 }
  0x17   :  { %42 = vst.msk [vmem:[#allocation2 + $0xb0] sm:$0xff] %vm19_vm1, %v1212_v27 }
  0x18   :  { %43 = vst.msk [vmem:[#allocation2 + $0xb8] sm:$0xff] %vm19_vm1, %v1212_v27  ;;  %v100_v49 = vld [vmem:[#allocation2 + $0x80] sm:$0xff] }
  0x19   :  { %44 = vst.msk [vmem:[#allocation2 + $0xc0] sm:$0xff] %vm19_vm1, %v1212_v27  ;;  %v101_v57 = vld [vmem:[#allocation2 + $0x88] sm:$0xff] }
  0x1a   :  { %45 = vst.msk [vmem:[#allocation2 + $0xc8] sm:$0xff] %vm19_vm1, %v1212_v27  ;;  %v102_v3 = vld [vmem:[#allocation2 + $0x90] sm:$0xff] }
  0x1b   :  { %46 = vst.msk [vmem:[#allocation2 + $0xd0] sm:$0xff] %vm19_vm1, %v1212_v27 }
  0x1c   :  { %47 = vst.msk [vmem:[#allocation2 + $0xd8] sm:$0xff] %vm19_vm1, %v1212_v27 }
  0x1d   :  { %1135 = vmatmul.msk.bf16.gmra.mxu0 %vm396_vm0, %v1167_v7  ;;  %1143 = vmatmul.msk.bf16.gmra.mxu1 %vm396_vm0, %v1175_v8  ;;  %48 = vst.msk [vmem:[#allocation2 + $0xe0] sm:$0xff] %vm19_vm1, %v1212_v27 }
  0x1e   :  { %1151 = vmatmul.msk.bf16.gmra.mxu2 %vm396_vm0, %v1183_v9  ;;  %1159 = vmatmul.msk.bf16.gmra.mxu3 %vm396_vm0, %v1191_v10  ;;  %49 = vst.msk [vmem:[#allocation2 + $0xe8] sm:$0xff] %vm19_vm1, %v1212_v27 }
  0x1f   :  { %50 = vst.msk [vmem:[#allocation2 + $0xf0] sm:$0xff] %vm19_vm1, %v1212_v27 }
  0x20   :  { %51 = vst.msk [vmem:[#allocation2 + $0xf8] sm:$0xff] %vm19_vm1, %v1212_v27 }
  0x21   :  { %52 = vst.msk [vmem:[#allocation2 + $0x100] sm:$0xff] %vm19_vm1, %v1212_v27 }
  0x22   :  { %53 = vst.msk [vmem:[#allocation2 + $0x108] sm:$0xff] %vm19_vm1, %v1212_v27 }
  0x23   :  { %54 = vst.msk [vmem:[#allocation2 + $0x110] sm:$0xff] %vm19_vm1, %v1212_v27 }
  0x24   :  { %55 = vst.msk [vmem:[#allocation2 + $0x118] sm:$0xff] %vm19_vm1, %v1212_v27 }
  0x25   :  { %56 = vst.msk [vmem:[#allocation2 + $0x120] sm:$0xff] %vm19_vm1, %v1212_v27 }
  0x26   :  { %57 = vst.msk [vmem:[#allocation2 + $0x128] sm:$0xff] %vm19_vm1, %v1212_v27 }
  0x27   :  { %58 = vst.msk [vmem:[#allocation2 + $0x130] sm:$0xff] %vm19_vm1, %v1212_v27 }
  0x28   :  { %59 = vst.msk [vmem:[#allocation2 + $0x138] sm:$0xff] %vm19_vm1, %v1212_v27  ;;  %v116_v52 = vld [vmem:[#allocation2 + $0x100] sm:$0xff] }
  0x29   :  { %60 = vst.msk [vmem:[#allocation2 + $0x140] sm:$0xff] %vm19_vm1, %v1212_v27  ;;  %v117_v59 = vld [vmem:[#allocation2 + $0x108] sm:$0xff] }
  0x2a   :  { %61 = vst.msk [vmem:[#allocation2 + $0x148] sm:$0xff] %vm19_vm1, %v1212_v27  ;;  %v118_v7 = vld [vmem:[#allocation2 + $0x110] sm:$0xff] }
  0x2b   :  { %62 = vst.msk [vmem:[#allocation2 + $0x150] sm:$0xff] %vm19_vm1, %v1212_v27 }
  0x2c   :  { %63 = vst.msk [vmem:[#allocation2 + $0x158] sm:$0xff] %vm19_vm1, %v1212_v27 }
  0x2d   :  { %1136 = vmatmul.msk.bf16.gmra.mxu0 %vm396_vm0, %v1168_v11  ;;  %1144 = vmatmul.msk.bf16.gmra.mxu1 %vm396_vm0, %v1176_v12  ;;  %64 = vst.msk [vmem:[#allocation2 + $0x160] sm:$0xff] %vm19_vm1, %v1212_v27 }
  0x2e   :  { %1152 = vmatmul.msk.bf16.gmra.mxu2 %vm396_vm0, %v1184_v13  ;;  %1160 = vmatmul.msk.bf16.gmra.mxu3 %vm396_vm0, %v1192_v14  ;;  %65 = vst.msk [vmem:[#allocation2 + $0x168] sm:$0xff] %vm19_vm1, %v1212_v27 }
  0x2f   :  { %66 = vst.msk [vmem:[#allocation2 + $0x170] sm:$0xff] %vm19_vm1, %v1212_v27 }
  0x30   :  { %67 = vst.msk [vmem:[#allocation2 + $0x178] sm:$0xff] %vm19_vm1, %v1212_v27 }
  0x31   :  { %68 = vst.msk [vmem:[#allocation2 + $0x180] sm:$0xff] %vm19_vm1, %v1212_v27 }
  0x32   :  { %69 = vst.msk [vmem:[#allocation2 + $0x188] sm:$0xff] %vm19_vm1, %v1212_v27 }
  0x33   :  { %70 = vst.msk [vmem:[#allocation2 + $0x190] sm:$0xff] %vm19_vm1, %v1212_v27 }
  0x34   :  { %71 = vst.msk [vmem:[#allocation2 + $0x198] sm:$0xff] %vm19_vm1, %v1212_v27 }
  0x35   :  { %72 = vst.msk [vmem:[#allocation2 + $0x1a0] sm:$0xff] %vm19_vm1, %v1212_v27 }
  0x36   :  { %73 = vst.msk [vmem:[#allocation2 + $0x1a8] sm:$0xff] %vm19_vm1, %v1212_v27 }
  0x37   :  { %74 = vst.msk [vmem:[#allocation2 + $0x1b0] sm:$0xff] %vm19_vm1, %v1212_v27 }
  0x38   :  { %75 = vst.msk [vmem:[#allocation2 + $0x1b8] sm:$0xff] %vm19_vm1, %v1212_v27  ;;  %v132_v53 = vld [vmem:[#allocation2 + $0x180] sm:$0xff] }
  0x39   :  { %76 = vst.msk [vmem:[#allocation2 + $0x1c0] sm:$0xff] %vm19_vm1, %v1212_v27  ;;  %v133_v61 = vld [vmem:[#allocation2 + $0x188] sm:$0xff] }
  0x3a   :  { %77 = vst.msk [vmem:[#allocation2 + $0x1c8] sm:$0xff] %vm19_vm1, %v1212_v27 }
  0x3b   :  { %78 = vst.msk [vmem:[#allocation2 + $0x1d0] sm:$0xff] %vm19_vm1, %v1212_v27 }
  0x3c   :  { %79 = vst.msk [vmem:[#allocation2 + $0x1d8] sm:$0xff] %vm19_vm1, %v1212_v27 }
  0x3d   :  { %1137 = vmatmul.msk.bf16.gmra.mxu0 %vm396_vm0, %v1169_v15  ;;  %1145 = vmatmul.msk.bf16.gmra.mxu1 %vm396_vm0, %v1177_v16  ;;  %80 = vst.msk [vmem:[#allocation2 + $0x1e0] sm:$0xff] %vm19_vm1, %v1212_v27 }
  0x3e   :  { %1153 = vmatmul.msk.bf16.gmra.mxu2 %vm396_vm0, %v1185_v17  ;;  %1161 = vmatmul.msk.bf16.gmra.mxu3 %vm396_vm0, %v1193_v18  ;;  %81 = vst.msk [vmem:[#allocation2 + $0x1e8] sm:$0xff] %vm19_vm1, %v1212_v27 }
  0x3f   :  { %82 = vst.msk [vmem:[#allocation2 + $0x1f0] sm:$0xff] %vm19_vm1, %v1212_v27 }
  0x40   :  { %83 = vst.msk [vmem:[#allocation2 + $0x1f8] sm:$0xff] %vm19_vm1, %v1212_v27 }
  0x4d   :  { %1138 = vmatmul.msk.bf16.gmra.mxu0 %vm396_vm0, %v1170_v19  ;;  %1146 = vmatmul.msk.bf16.gmra.mxu1 %vm396_vm0, %v1178_v20 }
  0x4e   :  { %1154 = vmatmul.msk.bf16.gmra.mxu2 %vm396_vm0, %v1186_v21  ;;  %1162 = vmatmul.msk.bf16.gmra.mxu3 %vm396_vm0, %v1194_v22 }
  0x5d   :  { %1139 = vmatmul.msk.bf16.gmra.mxu0 %vm396_vm0, %v1171_v23  ;;  %1147 = vmatmul.msk.bf16.gmra.mxu1 %vm396_vm0, %v1179_v24 }
  0x5e   :  { %1155 = vmatmul.msk.bf16.gmra.mxu2 %vm396_vm0, %v1187_v25  ;;  %1163 = vmatmul.msk.bf16.gmra.mxu3 %vm396_vm0, %v1195_v26 }
  0x6d   :  { %1140 = vmatmul.msk.bf16.gmra.mxu0 %vm396_vm0, %v1172_v28  ;;  %1148 = vmatmul.msk.bf16.gmra.mxu1 %vm396_vm0, %v1180_v29  ;;  %v134_v28 = vld [vmem:[#allocation2 + $0x190] sm:$0xff] }
  0x6e   :  { %1156 = vmatmul.msk.bf16.gmra.mxu2 %vm396_vm0, %v1188_v30  ;;  %1164 = vmatmul.msk.bf16.gmra.mxu3 %vm396_vm0, %v1196_v31  ;;  %v87_v31 = vld [vmem:[#allocation2 + $0x18] sm:$0xff] }
  0x7d   :  { %1141 = vmatmul.msk.bf16.gmra.mxu0 %vm396_vm0, %v1173_v32  ;;  %1149 = vmatmul.msk.bf16.gmra.mxu1 %vm396_vm0, %v1181_v33 }
  0x7e   :  { %1157 = vmatmul.msk.bf16.gmra.mxu2 %vm396_vm0, %v1189_v34  ;;  %1165 = vmatmul.msk.bf16.gmra.mxu3 %vm396_vm0, %v1197_v35  ;;  %v103_v34 = vld [vmem:[#allocation2 + $0x98] sm:$0xff] }
  0x8a   :  { %v502_v37 = vpop.f32.mrf.mxu0  ;;  %v542_v38 = vpop.f32.mrf.mxu1 }
  0x8b   :  { %v662_v39 = vadd.f32 %v502_v37, %v84_v36  ;;  %v678_v54 = vadd.f32 %v542_v38, %v100_v49  ;;  %v119_v38 = vld [vmem:[#allocation2 + $0x118] sm:$0xff] }
  0x8d   :  { %727 = vst.msk [vmem:[#allocation2] sm:$0xff] %vm19_vm1, %v662_v39 }
  0x8e   :  { %743 = vst.msk [vmem:[#allocation2 + $0x80] sm:$0xff] %vm19_vm1, %v678_v54  ;;  %v136_v54 = vld [vmem:[#allocation2 + $0x1a0] sm:$0xff] }
  0x91   :  { %v582_v41 = vpop.f32.mrf.mxu2  ;;  %v622_v42 = vpop.f32.mrf.mxu3 }
  0x92   :  { %v504_v43 = vpop.f32.mrf.mxu0  ;;  %v544_v44 = vpop.f32.mrf.mxu1  ;;  %v694_v56 = vadd.f32 %v582_v41, %v116_v52  ;;  %v710_v58 = vadd.f32 %v622_v42, %v132_v53  ;;  %v120_v52 = vld [vmem:[#allocation2 + $0x120] sm:$0xff] }
  0x93   :  { %v663_v60 = vadd.f32 %v504_v43, %v85_v55  ;;  %v679_v62 = vadd.f32 %v544_v44, %v101_v57  ;;  %v135_v44 = vld [vmem:[#allocation2 + $0x198] sm:$0xff] }
  0x94   :  { %v794_v45 = vld [vmem:[#allocation2] sm:$0xff]  ;;  %759 = vst.msk [vmem:[#allocation2 + $0x100] sm:$0xff] %vm19_vm1, %v694_v56  ;;  %v89_v56 = vld [vmem:[#allocation2 + $0x28] sm:$0xff] }
  0x95   :  { %v862_v46 = vadd.f32 %v1472_v40, %v794_v45  ;;  %775 = vst.msk [vmem:[#allocation2 + $0x180] sm:$0xff] %vm19_vm1, %v710_v58  ;;  %v810_v11 = vld [vmem:[#allocation2 + $0x80] sm:$0xff] }
  0x96   :  { %728 = vst.msk [vmem:[#allocation2 + $0x8] sm:$0xff] %vm19_vm1, %v663_v60  ;;  %v878_v12 = vadd.f32 %v1472_v40, %v810_v11 }
  0x97   :  { %926 = vst.msk [vmem:[%s1893_s3] sm:$0xff] %vm19_vm1, %v862_v46 }
  0x98   :  { %744 = vst.msk [vmem:[#allocation2 + $0x88] sm:$0xff] %vm19_vm1, %v679_v62 }
  0x99   :  { %v584_v47 = vpop.f32.mrf.mxu2  ;;  %v624_v48 = vpop.f32.mrf.mxu3  ;;  %942 = vst.msk [vmem:[%s1893_s3 + $0x80] sm:$0xff] %vm19_vm1, %v878_v12 }
  0x9a   :  { %v507_v50 = vpop.f32.mrf.mxu0  ;;  %v547_v51 = vpop.f32.mrf.mxu1  ;;  %v695_v2 = vadd.f32 %v584_v47, %v117_v59  ;;  %v711_v6 = vadd.f32 %v624_v48, %v133_v61  ;;  %v88_v48 = vld [vmem:[#allocation2 + $0x20] sm:$0xff] }
  0x9b   :  { %v664_v8 = vadd.f32 %v507_v50, %v86_v63  ;;  %v680_v9 = vadd.f32 %v547_v51, %v102_v3  ;;  %v826_v13 = vld [vmem:[#allocation2 + $0x100] sm:$0xff] }
  0x9c   :  { %760 = vst.msk [vmem:[#allocation2 + $0x108] sm:$0xff] %vm19_vm1, %v695_v2  ;;  %v894_v16 = vadd.f32 %v1472_v40, %v826_v13  ;;  %v842_v17 = vld [vmem:[#allocation2 + $0x180] sm:$0xff] }
  0x9d   :  { %776 = vst.msk [vmem:[#allocation2 + $0x188] sm:$0xff] %vm19_vm1, %v711_v6  ;;  %v910_v20 = vadd.f32 %v1472_v40, %v842_v17  ;;  %v795_v21 = vld [vmem:[#allocation2 + $0x8] sm:$0xff]  ;;  %v104_v50 = vld [vmem:[#allocation2 + $0xa0] sm:$0xff] }
  0x9e   :  { %729 = vst.msk [vmem:[#allocation2 + $0x10] sm:$0xff] %vm19_vm1, %v664_v8  ;;  %v863_v22 = vadd.f32 %v1472_v40, %v795_v21 }
  0x9f   :  { %745 = vst.msk [vmem:[#allocation2 + $0x90] sm:$0xff] %vm19_vm1, %v680_v9  ;;  %v811_v23 = vld [vmem:[#allocation2 + $0x88] sm:$0xff] }
  0xa0   :  { %958 = vst.msk [vmem:[%s1893_s3 + $0x100] sm:$0xff] %vm19_vm1, %v894_v16  ;;  %v879_v24 = vadd.f32 %v1472_v40, %v811_v23  ;;  %v137_v23 = vld [vmem:[#allocation2 + $0x1a8] sm:$0xff] }
  0xa1   :  { %v587_v0 = vpop.f32.mrf.mxu2  ;;  %v627_v1 = vpop.f32.mrf.mxu3  ;;  %974 = vst.msk [vmem:[%s1893_s3 + $0x180] sm:$0xff] %vm19_vm1, %v910_v20  ;;  %v121_v20 = vld [vmem:[#allocation2 + $0x128] sm:$0xff] }
  0xa2   :  { %v509_v4 = vpop.f32.mrf.mxu0  ;;  %v549_v5 = vpop.f32.mrf.mxu1  ;;  %v696_v10 = vadd.f32 %v587_v0, %v118_v7  ;;  %927 = vst.msk [vmem:[%s1893_s3 + $0x8] sm:$0xff] %vm19_vm1, %v863_v22  ;;  %v712_v37 = vadd.f32 %v627_v1, %v134_v28 }
  0xa3   :  { %v827_v25 = vld [vmem:[#allocation2 + $0x108] sm:$0xff]  ;;  %943 = vst.msk [vmem:[%s1893_s3 + $0x88] sm:$0xff] %vm19_vm1, %v879_v24  ;;  %v665_v43 = vadd.f32 %v509_v4, %v87_v31  ;;  %v681_v47 = vadd.f32 %v549_v5, %v103_v34  ;;  %v138_v34 = vld [vmem:[#allocation2 + $0x1b0] sm:$0xff] }
  0xa4   :  { %761 = vst.msk [vmem:[#allocation2 + $0x110] sm:$0xff] %vm19_vm1, %v696_v10  ;;  %v895_v26 = vadd.f32 %v1472_v40, %v827_v25  ;;  %v843_v27 = vld [vmem:[#allocation2 + $0x188] sm:$0xff] }
  0xa5   :  { %v911_v29 = vadd.f32 %v1472_v40, %v843_v27  ;;  %v796_v30 = vld [vmem:[#allocation2 + $0x10] sm:$0xff]  ;;  %777 = vst.msk [vmem:[#allocation2 + $0x190] sm:$0xff] %vm19_vm1, %v712_v37 }
  0xa6   :  { %959 = vst.msk [vmem:[%s1893_s3 + $0x108] sm:$0xff] %vm19_vm1, %v895_v26  ;;  %v864_v32 = vadd.f32 %v1472_v40, %v796_v30  ;;  %v812_v33 = vld [vmem:[#allocation2 + $0x90] sm:$0xff] }
  0xa7   :  { %975 = vst.msk [vmem:[%s1893_s3 + $0x188] sm:$0xff] %vm19_vm1, %v911_v29  ;;  %v880_v35 = vadd.f32 %v1472_v40, %v812_v33  ;;  %v90_v27 = vld [vmem:[#allocation2 + $0x30] sm:$0xff] }
  0xa8   :  { %928 = vst.msk [vmem:[%s1893_s3 + $0x10] sm:$0xff] %vm19_vm1, %v864_v32  ;;  %v106_v30 = vld [vmem:[#allocation2 + $0xb0] sm:$0xff] }
  0xa9   :  { %v589_v14 = vpop.f32.mrf.mxu2  ;;  %v629_v15 = vpop.f32.mrf.mxu3  ;;  %944 = vst.msk [vmem:[%s1893_s3 + $0x90] sm:$0xff] %vm19_vm1, %v880_v35  ;;  %v122_v32 = vld [vmem:[#allocation2 + $0x130] sm:$0xff] }
  0xaa   :  { %v512_v18 = vpop.f32.mrf.mxu0  ;;  %v552_v19 = vpop.f32.mrf.mxu1  ;;  %v697_v49 = vadd.f32 %v589_v14, %v119_v38  ;;  %v713_v51 = vadd.f32 %v629_v15, %v135_v44  ;;  %730 = vst.msk [vmem:[#allocation2 + $0x18] sm:$0xff] %vm19_vm1, %v665_v43  ;;  %v105_v15 = vld [vmem:[#allocation2 + $0xa8] sm:$0xff] }
  0xab   :  { %v828_v36 = vld [vmem:[#allocation2 + $0x110] sm:$0xff]  ;;  %v666_v53 = vadd.f32 %v512_v18, %v88_v48  ;;  %746 = vst.msk [vmem:[#allocation2 + $0x98] sm:$0xff] %vm19_vm1, %v681_v47  ;;  %v682_v55 = vadd.f32 %v552_v19, %v104_v50 }
  0xac   :  { %v896_v42 = vadd.f32 %v1472_v40, %v828_v36  ;;  %762 = vst.msk [vmem:[#allocation2 + $0x118] sm:$0xff] %vm19_vm1, %v697_v49  ;;  %v844_v0 = vld [vmem:[#allocation2 + $0x190] sm:$0xff]  ;;  %v91_v36 = vld [vmem:[#allocation2 + $0x38] sm:$0xff] }
  0xad   :  { %778 = vst.msk [vmem:[#allocation2 + $0x198] sm:$0xff] %vm19_vm1, %v713_v51  ;;  %v912_v1 = vadd.f32 %v1472_v40, %v844_v0 }
  0xae   :  { %960 = vst.msk [vmem:[%s1893_s3 + $0x110] sm:$0xff] %vm19_vm1, %v896_v42 }
  0xaf   :  { %731 = vst.msk [vmem:[#allocation2 + $0x20] sm:$0xff] %vm19_vm1, %v666_v53 }
  0xb0   :  { %747 = vst.msk [vmem:[#allocation2 + $0xa0] sm:$0xff] %vm19_vm1, %v682_v55 }
  0xb1   :  { %v592_v39 = vpop.f32.mrf.mxu2  ;;  %v632_v41 = vpop.f32.mrf.mxu3  ;;  %v797_v2 = vld [vmem:[#allocation2 + $0x18] sm:$0xff]  ;;  %976 = vst.msk [vmem:[%s1893_s3 + $0x190] sm:$0xff] %vm19_vm1, %v912_v1 }
  0xb2   :  { %v514_v45 = vpop.f32.mrf.mxu0  ;;  %v1561_v46 = vpop.f32.mrf.mxu1  ;;  %v698_v57 = vadd.f32 %v592_v39, %v120_v52  ;;  %v714_v58 = vadd.f32 %v632_v41, %v136_v54  ;;  %v865_v3 = vadd.f32 %v1472_v40, %v797_v2  ;;  %v813_v4 = vld [vmem:[#allocation2 + $0x98] sm:$0xff] }
  0xb3   :  { %v667_v61 = vadd.f32 %v514_v45, %v89_v56  ;;  %v881_v5 = vadd.f32 %v1472_v40, %v813_v4  ;;  %v829_v6 = vld [vmem:[#allocation2 + $0x118] sm:$0xff]  ;;  %v683_v26 = vadd.f32 %v1561_v46, %v105_v15 }
  0xb4   :  { %763 = vst.msk [vmem:[#allocation2 + $0x120] sm:$0xff] %vm19_vm1, %v698_v57  ;;  %v897_v7 = vadd.f32 %v1472_v40, %v829_v6  ;;  %v845_v8 = vld [vmem:[#allocation2 + $0x198] sm:$0xff] }
  0xb5   :  { %779 = vst.msk [vmem:[#allocation2 + $0x1a0] sm:$0xff] %vm19_vm1, %v714_v58  ;;  %v913_v9 = vadd.f32 %v1472_v40, %v845_v8  ;;  %v107_v41 = vld [vmem:[#allocation2 + $0xb8] sm:$0xff]  ;;  %v108_v8 = vld [vmem:[#allocation2 + $0xc0] sm:$0xff] }
  0xb6   :  { %732 = vst.msk [vmem:[#allocation2 + $0x28] sm:$0xff] %vm19_vm1, %v667_v61  ;;  %v798_v10 = vld [vmem:[#allocation2 + $0x20] sm:$0xff]  ;;  %v123_v45 = vld [vmem:[#allocation2 + $0x138] sm:$0xff] }
  0xb7   :  { %929 = vst.msk [vmem:[%s1893_s3 + $0x18] sm:$0xff] %vm19_vm1, %v865_v3  ;;  %v866_v13 = vadd.f32 %v1472_v40, %v798_v10  ;;  %v814_v14 = vld [vmem:[#allocation2 + $0xa0] sm:$0xff]  ;;  %v139_v2 = vld [vmem:[#allocation2 + $0x1b8] sm:$0xff] }
  0xb8   :  { %945 = vst.msk [vmem:[%s1893_s3 + $0x98] sm:$0xff] %vm19_vm1, %v881_v5  ;;  %v882_v18 = vadd.f32 %v1472_v40, %v814_v14  ;;  %v92_v5 = vld [vmem:[#allocation2 + $0x40] sm:$0xff] }
  0xb9   :  { %v594_v59 = vpop.f32.mrf.mxu2  ;;  %v634_v60 = vpop.f32.mrf.mxu3  ;;  %961 = vst.msk [vmem:[%s1893_s3 + $0x118] sm:$0xff] %vm19_vm1, %v897_v7 }
  0xba   :  { %v517_v62 = vpop.f32.mrf.mxu0  ;;  %v557_v63 = vpop.f32.mrf.mxu1  ;;  %977 = vst.msk [vmem:[%s1893_s3 + $0x198] sm:$0xff] %vm19_vm1, %v913_v9  ;;  %v699_v29 = vadd.f32 %v594_v59, %v121_v20  ;;  %v715_v31 = vadd.f32 %v634_v60, %v137_v23  ;;  %v93_v20 = vld [vmem:[#allocation2 + $0x48] sm:$0xff] }
  0xbb   :  { %v830_v19 = vld [vmem:[#allocation2 + $0x120] sm:$0xff]  ;;  %930 = vst.msk [vmem:[%s1893_s3 + $0x20] sm:$0xff] %vm19_vm1, %v866_v13  ;;  %v668_v33 = vadd.f32 %v517_v62, %v90_v27  ;;  %v684_v35 = vadd.f32 %v557_v63, %v106_v30 }
  0xbc   :  { %v898_v21 = vadd.f32 %v1472_v40, %v830_v19  ;;  %v846_v22 = vld [vmem:[#allocation2 + $0x1a0] sm:$0xff]  ;;  %946 = vst.msk [vmem:[%s1893_s3 + $0xa0] sm:$0xff] %vm19_vm1, %v882_v18 }
  0xbd   :  { %v914_v24 = vadd.f32 %v1472_v40, %v846_v22  ;;  %v799_v25 = vld [vmem:[#allocation2 + $0x28] sm:$0xff]  ;;  %748 = vst.msk [vmem:[#allocation2 + $0xa8] sm:$0xff] %vm19_vm1, %v683_v26 }
  0xbe   :  { %962 = vst.msk [vmem:[%s1893_s3 + $0x120] sm:$0xff] %vm19_vm1, %v898_v21  ;;  %v867_v28 = vadd.f32 %v1472_v40, %v799_v25  ;;  %v109_v22 = vld [vmem:[#allocation2 + $0xc8] sm:$0xff] }
  0xbf   :  { %978 = vst.msk [vmem:[%s1893_s3 + $0x1a0] sm:$0xff] %vm19_vm1, %v914_v24  ;;  %v125_v24 = vld [vmem:[#allocation2 + $0x148] sm:$0xff] }
  0xc0   :  { %931 = vst.msk [vmem:[%s1893_s3 + $0x28] sm:$0xff] %vm19_vm1, %v867_v28  ;;  %v141_v26 = vld [vmem:[#allocation2 + $0x1c8] sm:$0xff] }
  0xc1   :  { %v597_v11 = vpop.f32.mrf.mxu2  ;;  %v637_v12 = vpop.f32.mrf.mxu3  ;;  %764 = vst.msk [vmem:[#allocation2 + $0x128] sm:$0xff] %vm19_vm1, %v699_v29  ;;  %v94_v29 = vld [vmem:[#allocation2 + $0x50] sm:$0xff] }
  0xc2   :  { %v519_v16 = vpop.f32.mrf.mxu0  ;;  %v559_v17 = vpop.f32.mrf.mxu1  ;;  %v700_v39 = vadd.f32 %v597_v11, %v122_v32  ;;  %780 = vst.msk [vmem:[#allocation2 + $0x1a8] sm:$0xff] %vm19_vm1, %v715_v31  ;;  %v716_v44 = vadd.f32 %v637_v12, %v138_v34  ;;  %v124_v12 = vld [vmem:[#allocation2 + $0x140] sm:$0xff] }
  0xc3   :  { %733 = vst.msk [vmem:[#allocation2 + $0x30] sm:$0xff] %vm19_vm1, %v668_v33  ;;  %v669_v46 = vadd.f32 %v519_v16, %v91_v36  ;;  %v685_v47 = vadd.f32 %v559_v17, %v107_v41  ;;  %v140_v17 = vld [vmem:[#allocation2 + $0x1c0] sm:$0xff] }
  0xc4   :  { %749 = vst.msk [vmem:[#allocation2 + $0xb0] sm:$0xff] %vm19_vm1, %v684_v35  ;;  %v815_v49 = vld [vmem:[#allocation2 + $0xa8] sm:$0xff] }
  0xc5   :  { %765 = vst.msk [vmem:[#allocation2 + $0x130] sm:$0xff] %vm19_vm1, %v700_v39  ;;  %v883_v50 = vadd.f32 %v1472_v40, %v815_v49 }
  0xc6   :  { %781 = vst.msk [vmem:[#allocation2 + $0x1b0] sm:$0xff] %vm19_vm1, %v716_v44 }
  0xc7   :  { %734 = vst.msk [vmem:[#allocation2 + $0x38] sm:$0xff] %vm19_vm1, %v669_v46 }
  0xc8   :  { %v831_v51 = vld [vmem:[#allocation2 + $0x128] sm:$0xff]  ;;  %750 = vst.msk [vmem:[#allocation2 + $0xb8] sm:$0xff] %vm19_vm1, %v685_v47 }
  0xc9   :  { %v599_v37 = vpop.f32.mrf.mxu2  ;;  %v639_v38 = vpop.f32.mrf.mxu3  ;;  %v899_v54 = vadd.f32 %v1472_v40, %v831_v51  ;;  %v847_v55 = vld [vmem:[#allocation2 + $0x1a8] sm:$0xff]  ;;  %947 = vst.msk [vmem:[%s1893_s3 + $0xa8] sm:$0xff] %vm19_vm1, %v883_v50 }
  0xca   :  { %v522_v42 = vpop.f32.mrf.mxu0  ;;  %v562_v43 = vpop.f32.mrf.mxu1  ;;  %v701_v48 = vadd.f32 %v599_v37, %v123_v45  ;;  %v915_v57 = vadd.f32 %v1472_v40, %v847_v55  ;;  %v800_v58 = vld [vmem:[#allocation2 + $0x30] sm:$0xff]  ;;  %v717_v11 = vadd.f32 %v639_v38, %v139_v2 }
  0xcb   :  { %963 = vst.msk [vmem:[%s1893_s3 + $0x128] sm:$0xff] %vm19_vm1, %v899_v54  ;;  %v868_v59 = vadd.f32 %v1472_v40, %v800_v58  ;;  %v816_v60 = vld [vmem:[#allocation2 + $0xb0] sm:$0xff]  ;;  %v670_v16 = vadd.f32 %v522_v42, %v92_v5  ;;  %v686_v19 = vadd.f32 %v562_v43, %v108_v8  ;;  %v127_v5 = vld [vmem:[#allocation2 + $0x158] sm:$0xff] }
  0xcc   :  { %766 = vst.msk [vmem:[#allocation2 + $0x138] sm:$0xff] %vm19_vm1, %v701_v48  ;;  %v884_v62 = vadd.f32 %v1472_v40, %v816_v60  ;;  %v832_v63 = vld [vmem:[#allocation2 + $0x130] sm:$0xff] }
  0xcd   :  { %979 = vst.msk [vmem:[%s1893_s3 + $0x1a8] sm:$0xff] %vm19_vm1, %v915_v57  ;;  %v900_v0 = vadd.f32 %v1472_v40, %v832_v63  ;;  %v848_v1 = vld [vmem:[#allocation2 + $0x1b0] sm:$0xff] }
  0xce   :  { %932 = vst.msk [vmem:[%s1893_s3 + $0x30] sm:$0xff] %vm19_vm1, %v868_v59  ;;  %v916_v3 = vadd.f32 %v1472_v40, %v848_v1  ;;  %v801_v4 = vld [vmem:[#allocation2 + $0x38] sm:$0xff]  ;;  %v126_v57 = vld [vmem:[#allocation2 + $0x150] sm:$0xff] }
  0xcf   :  { %948 = vst.msk [vmem:[%s1893_s3 + $0xb0] sm:$0xff] %vm19_vm1, %v884_v62  ;;  %v869_v6 = vadd.f32 %v1472_v40, %v801_v4  ;;  %v817_v7 = vld [vmem:[#allocation2 + $0xb8] sm:$0xff]  ;;  %v142_v60 = vld [vmem:[#allocation2 + $0x1d0] sm:$0xff] }
  0xd0   :  { %964 = vst.msk [vmem:[%s1893_s3 + $0x130] sm:$0xff] %vm19_vm1, %v900_v0  ;;  %v885_v9 = vadd.f32 %v1472_v40, %v817_v7  ;;  %v95_v0 = vld [vmem:[#allocation2 + $0x58] sm:$0xff] }
  0xd1   :  { %v602_v52 = vpop.f32.mrf.mxu2  ;;  %v642_v53 = vpop.f32.mrf.mxu3  ;;  %980 = vst.msk [vmem:[%s1893_s3 + $0x1b0] sm:$0xff] %vm19_vm1, %v916_v3  ;;  %v111_v3 = vld [vmem:[#allocation2 + $0xd8] sm:$0xff] }
  0xd2   :  { %v524_v56 = vpop.f32.mrf.mxu0  ;;  %v564_v61 = vpop.f32.mrf.mxu1  ;;  %933 = vst.msk [vmem:[%s1893_s3 + $0x38] sm:$0xff] %vm19_vm1, %v869_v6  ;;  %v702_v21 = vadd.f32 %v602_v52, %v124_v12  ;;  %v718_v23 = vadd.f32 %v642_v53, %v140_v17  ;;  %v110_v53 = vld [vmem:[#allocation2 + $0xd0] sm:$0xff]  ;;  %v143_v7 = vld [vmem:[#allocation2 + $0x1d8] sm:$0xff]  ;;  %v112_v12 = vld [vmem:[#allocation2 + $0xe0] sm:$0xff] }
  0xd3   :  { %v833_v10 = vld [vmem:[#allocation2 + $0x138] sm:$0xff]  ;;  %949 = vst.msk [vmem:[%s1893_s3 + $0xb8] sm:$0xff] %vm19_vm1, %v885_v9  ;;  %v671_v25 = vadd.f32 %v524_v56, %v93_v20  ;;  %v687_v28 = vadd.f32 %v564_v61, %v109_v22  ;;  %v96_v9 = vld [vmem:[#allocation2 + $0x60] sm:$0xff] }
  0xd4   :  { %v901_v15 = vadd.f32 %v1472_v40, %v833_v10  ;;  %782 = vst.msk [vmem:[#allocation2 + $0x1b8] sm:$0xff] %vm19_vm1, %v717_v11 }
  0xd5   :  { %735 = vst.msk [vmem:[#allocation2 + $0x40] sm:$0xff] %vm19_vm1, %v670_v16  ;;  %v128_v16 = vld [vmem:[#allocation2 + $0x160] sm:$0xff] }
  0xd6   :  { %965 = vst.msk [vmem:[%s1893_s3 + $0x138] sm:$0xff] %vm19_vm1, %v901_v15 }
  0xd7   :  { %751 = vst.msk [vmem:[#allocation2 + $0xc0] sm:$0xff] %vm19_vm1, %v686_v19 }
  0xd8   :  { %767 = vst.msk [vmem:[#allocation2 + $0x140] sm:$0xff] %vm19_vm1, %v702_v21 }
  0xd9   :  { %v604_v13 = vpop.f32.mrf.mxu2  ;;  %v644_v14 = vpop.f32.mrf.mxu3  ;;  %783 = vst.msk [vmem:[#allocation2 + $0x1c0] sm:$0xff] %vm19_vm1, %v718_v23 }
  0xda   :  { %v527_v18 = vpop.f32.mrf.mxu0  ;;  %v567_v27 = vpop.f32.mrf.mxu1  ;;  %v703_v30 = vadd.f32 %v604_v13, %v125_v24  ;;  %v719_v31 = vadd.f32 %v644_v14, %v141_v26  ;;  %736 = vst.msk [vmem:[#allocation2 + $0x48] sm:$0xff] %vm19_vm1, %v671_v25 }
  0xdb   :  { %v672_v34 = vadd.f32 %v527_v18, %v94_v29  ;;  %752 = vst.msk [vmem:[#allocation2 + $0xc8] sm:$0xff] %vm19_vm1, %v687_v28  ;;  %v849_v36 = vld [vmem:[#allocation2 + $0x1b8] sm:$0xff]  ;;  %v688_v63 = vadd.f32 %v567_v27, %v110_v53 }
  0xdc   :  { %768 = vst.msk [vmem:[#allocation2 + $0x148] sm:$0xff] %vm19_vm1, %v703_v30  ;;  %v917_v37 = vadd.f32 %v1472_v40, %v849_v36  ;;  %v802_v38 = vld [vmem:[#allocation2 + $0x40] sm:$0xff] }
  0xdd   :  { %784 = vst.msk [vmem:[#allocation2 + $0x1c8] sm:$0xff] %vm19_vm1, %v719_v31  ;;  %v870_v39 = vadd.f32 %v1472_v40, %v802_v38  ;;  %v144_v38 = vld [vmem:[#allocation2 + $0x1e0] sm:$0xff] }
  0xde   :  { %v818_v41 = vld [vmem:[#allocation2 + $0xc0] sm:$0xff]  ;;  %737 = vst.msk [vmem:[#allocation2 + $0x50] sm:$0xff] %vm19_vm1, %v672_v34 }
  0xdf   :  { %981 = vst.msk [vmem:[%s1893_s3 + $0x1b8] sm:$0xff] %vm19_vm1, %v917_v37  ;;  %v886_v42 = vadd.f32 %v1472_v40, %v818_v41  ;;  %v834_v43 = vld [vmem:[#allocation2 + $0x140] sm:$0xff] }
  0xe0   :  { %934 = vst.msk [vmem:[%s1893_s3 + $0x40] sm:$0xff] %vm19_vm1, %v870_v39  ;;  %v902_v44 = vadd.f32 %v1472_v40, %v834_v43  ;;  %v850_v45 = vld [vmem:[#allocation2 + $0x1c0] sm:$0xff] }
  0xe1   :  { %v607_v32 = vpop.f32.mrf.mxu2  ;;  %v647_v33 = vpop.f32.mrf.mxu3  ;;  %950 = vst.msk [vmem:[%s1893_s3 + $0xc0] sm:$0xff] %vm19_vm1, %v886_v42  ;;  %v918_v47 = vadd.f32 %v1472_v40, %v850_v45  ;;  %v803_v48 = vld [vmem:[#allocation2 + $0x48] sm:$0xff] }
  0xe2   :  { %v529_v35 = vpop.f32.mrf.mxu0  ;;  %v569_v46 = vpop.f32.mrf.mxu1  ;;  %966 = vst.msk [vmem:[%s1893_s3 + $0x140] sm:$0xff] %vm19_vm1, %v902_v44  ;;  %v871_v51 = vadd.f32 %v1472_v40, %v803_v48  ;;  %v819_v52 = vld [vmem:[#allocation2 + $0xc8] sm:$0xff]  ;;  %v704_v2 = vadd.f32 %v607_v32, %v126_v57  ;;  %v720_v4 = vadd.f32 %v647_v33, %v142_v60 }
  0xe3   :  { %982 = vst.msk [vmem:[%s1893_s3 + $0x1c0] sm:$0xff] %vm19_vm1, %v918_v47  ;;  %v887_v55 = vadd.f32 %v1472_v40, %v819_v52  ;;  %v835_v56 = vld [vmem:[#allocation2 + $0x148] sm:$0xff]  ;;  %v673_v6 = vadd.f32 %v529_v35, %v95_v0  ;;  %v689_v8 = vadd.f32 %v569_v46, %v111_v3 }
  0xe4   :  { %935 = vst.msk [vmem:[%s1893_s3 + $0x48] sm:$0xff] %vm19_vm1, %v871_v51  ;;  %v903_v58 = vadd.f32 %v1472_v40, %v835_v56  ;;  %v851_v59 = vld [vmem:[#allocation2 + $0x1c8] sm:$0xff]  ;;  %v114_v56 = vld [vmem:[#allocation2 + $0xf0] sm:$0xff] }
  0xe5   :  { %951 = vst.msk [vmem:[%s1893_s3 + $0xc8] sm:$0xff] %vm19_vm1, %v887_v55  ;;  %v919_v61 = vadd.f32 %v1472_v40, %v851_v59  ;;  %v804_v62 = vld [vmem:[#allocation2 + $0x50] sm:$0xff]  ;;  %v97_v42 = vld [vmem:[#allocation2 + $0x68] sm:$0xff] }
  0xe6   :  { %967 = vst.msk [vmem:[%s1893_s3 + $0x148] sm:$0xff] %vm19_vm1, %v903_v58  ;;  %v872_v1 = vadd.f32 %v1472_v40, %v804_v62  ;;  %v113_v45 = vld [vmem:[#allocation2 + $0xe8] sm:$0xff]  ;;  %v130_v58 = vld [vmem:[#allocation2 + $0x170] sm:$0xff] }
  0xe7   :  { %983 = vst.msk [vmem:[%s1893_s3 + $0x1c8] sm:$0xff] %vm19_vm1, %v919_v61  ;;  %v145_v52 = vld [vmem:[#allocation2 + $0x1e8] sm:$0xff]  ;;  %v146_v62 = vld [vmem:[#allocation2 + $0x1f0] sm:$0xff] }
  0xe8   :  { %936 = vst.msk [vmem:[%s1893_s3 + $0x50] sm:$0xff] %vm19_vm1, %v872_v1  ;;  %v99_v1 = vld [vmem:[#allocation2 + $0x78] sm:$0xff] }
  0xe9   :  { %v609_v49 = vpop.f32.mrf.mxu2  ;;  %v649_v50 = vpop.f32.mrf.mxu3  ;;  %753 = vst.msk [vmem:[#allocation2 + $0xd0] sm:$0xff] %vm19_vm1, %v688_v63 }
  0xea   :  { %v532_v54 = vpop.f32.mrf.mxu0  ;;  %769 = vst.msk [vmem:[#allocation2 + $0x150] sm:$0xff] %vm19_vm1, %v704_v2  ;;  %v705_v11 = vadd.f32 %v609_v49, %v127_v5  ;;  %v572_v13 = vpop.f32.mrf.mxu1  ;;  %v721_v15 = vadd.f32 %v649_v50, %v143_v7  ;;  %v129_v49 = vld [vmem:[#allocation2 + $0x168] sm:$0xff] }
  0xeb   :  { %785 = vst.msk [vmem:[#allocation2 + $0x1d0] sm:$0xff] %vm19_vm1, %v720_v4  ;;  %v674_v18 = vadd.f32 %v532_v54, %v96_v9  ;;  %v690_v19 = vadd.f32 %v572_v13, %v112_v12  ;;  %v98_v54 = vld [vmem:[#allocation2 + $0x70] sm:$0xff] }
  0xec   :  { %738 = vst.msk [vmem:[#allocation2 + $0x58] sm:$0xff] %vm19_vm1, %v673_v6 }
  0xed   :  { %754 = vst.msk [vmem:[#allocation2 + $0xd8] sm:$0xff] %vm19_vm1, %v689_v8 }
  0xee   :  { %770 = vst.msk [vmem:[#allocation2 + $0x158] sm:$0xff] %vm19_vm1, %v705_v11 }
  0xef   :  { %786 = vst.msk [vmem:[#allocation2 + $0x1d8] sm:$0xff] %vm19_vm1, %v721_v15 }
  0xf0   :  { %v820_v21 = vld [vmem:[#allocation2 + $0xd0] sm:$0xff]  ;;  %739 = vst.msk [vmem:[#allocation2 + $0x60] sm:$0xff] %vm19_vm1, %v674_v18 }
  0xf1   :  { %v612_v10 = vpop.f32.mrf.mxu2  ;;  %v652_v14 = vpop.f32.mrf.mxu3  ;;  %v888_v22 = vadd.f32 %v1472_v40, %v820_v21  ;;  %v836_v23 = vld [vmem:[#allocation2 + $0x150] sm:$0xff]  ;;  %755 = vst.msk [vmem:[#allocation2 + $0xe0] sm:$0xff] %vm19_vm1, %v690_v19  ;;  %v115_v19 = vld [vmem:[#allocation2 + $0xf8] sm:$0xff] }
  0xf2   :  { %v534_v17 = vpop.f32.mrf.mxu0  ;;  %v706_v20 = vadd.f32 %v612_v10, %v128_v16  ;;  %v904_v24 = vadd.f32 %v1472_v40, %v836_v23  ;;  %v852_v25 = vld [vmem:[#allocation2 + $0x1d0] sm:$0xff]  ;;  %v574_v31 = vpop.f32.mrf.mxu1  ;;  %v722_v48 = vadd.f32 %v652_v14, %v144_v38  ;;  %v131_v23 = vld [vmem:[#allocation2 + $0x178] sm:$0xff] }
  0xf3   :  { %952 = vst.msk [vmem:[%s1893_s3 + $0xd0] sm:$0xff] %vm19_vm1, %v888_v22  ;;  %v920_v26 = vadd.f32 %v1472_v40, %v852_v25  ;;  %v805_v27 = vld [vmem:[#allocation2 + $0x58] sm:$0xff]  ;;  %v675_v51 = vadd.f32 %v534_v17, %v97_v42  ;;  %v691_v53 = vadd.f32 %v574_v31, %v113_v45 }
  0xf4   :  { %771 = vst.msk [vmem:[#allocation2 + $0x160] sm:$0xff] %vm19_vm1, %v706_v20  ;;  %v873_v29 = vadd.f32 %v1472_v40, %v805_v27  ;;  %v821_v30 = vld [vmem:[#allocation2 + $0xd8] sm:$0xff] }
  0xf5   :  { %968 = vst.msk [vmem:[%s1893_s3 + $0x150] sm:$0xff] %vm19_vm1, %v904_v24  ;;  %v889_v33 = vadd.f32 %v1472_v40, %v821_v30  ;;  %v837_v34 = vld [vmem:[#allocation2 + $0x158] sm:$0xff] }
  0xf6   :  { %984 = vst.msk [vmem:[%s1893_s3 + $0x1d0] sm:$0xff] %vm19_vm1, %v920_v26  ;;  %v905_v36 = vadd.f32 %v1472_v40, %v837_v34  ;;  %v853_v37 = vld [vmem:[#allocation2 + $0x1d8] sm:$0xff] }
  0xf7   :  { %937 = vst.msk [vmem:[%s1893_s3 + $0x58] sm:$0xff] %vm19_vm1, %v873_v29  ;;  %v921_v39 = vadd.f32 %v1472_v40, %v853_v37  ;;  %v806_v41 = vld [vmem:[#allocation2 + $0x60] sm:$0xff]  ;;  %v147_v27 = vld [vmem:[#allocation2 + $0x1f8] sm:$0xff] }
  0xf8   :  { %953 = vst.msk [vmem:[%s1893_s3 + $0xd8] sm:$0xff] %vm19_vm1, %v889_v33  ;;  %v874_v43 = vadd.f32 %v1472_v40, %v806_v41  ;;  %v822_v44 = vld [vmem:[#allocation2 + $0xe0] sm:$0xff] }
  0xf9   :  { %v614_v28 = vpop.f32.mrf.mxu2  ;;  %v654_v32 = vpop.f32.mrf.mxu3  ;;  %969 = vst.msk [vmem:[%s1893_s3 + $0x158] sm:$0xff] %vm19_vm1, %v905_v36  ;;  %v890_v46 = vadd.f32 %v1472_v40, %v822_v44 }
  0xfa   :  { %v537_v35 = vpop.f32.mrf.mxu0  ;;  %985 = vst.msk [vmem:[%s1893_s3 + $0x1d8] sm:$0xff] %vm19_vm1, %v921_v39  ;;  %v707_v55 = vadd.f32 %v614_v28, %v129_v49  ;;  %v723_v57 = vadd.f32 %v654_v32, %v145_v52  ;;  %v577_v61 = vpop.f32.mrf.mxu1 }
  0xfb   :  { %v838_v47 = vld [vmem:[#allocation2 + $0x160] sm:$0xff]  ;;  %938 = vst.msk [vmem:[%s1893_s3 + $0x60] sm:$0xff] %vm19_vm1, %v874_v43  ;;  %v676_v60 = vadd.f32 %v537_v35, %v98_v54  ;;  %v692_v0 = vadd.f32 %v577_v61, %v114_v56 }
  0xfc   :  { %v906_v50 = vadd.f32 %v1472_v40, %v838_v47  ;;  %954 = vst.msk [vmem:[%s1893_s3 + $0xe0] sm:$0xff] %vm19_vm1, %v890_v46 }
  0xfd   :  { %787 = vst.msk [vmem:[#allocation2 + $0x1e0] sm:$0xff] %vm19_vm1, %v722_v48 }
  0xfe   :  { %970 = vst.msk [vmem:[%s1893_s3 + $0x160] sm:$0xff] %vm19_vm1, %v906_v50 }
  0xff   :  { %740 = vst.msk [vmem:[#allocation2 + $0x68] sm:$0xff] %vm19_vm1, %v675_v51 }
 0x100   :  { %756 = vst.msk [vmem:[#allocation2 + $0xe8] sm:$0xff] %vm19_vm1, %v691_v53 }
 0x101   :  { %v617_v59 = vpop.f32.mrf.mxu2  ;;  %v657_v63 = vpop.f32.mrf.mxu3  ;;  %772 = vst.msk [vmem:[#allocation2 + $0x168] sm:$0xff] %vm19_vm1, %v707_v55 }
 0x102   :  { %v539_v2 = vpop.f32.mrf.mxu0  ;;  %v708_v3 = vadd.f32 %v617_v59, %v130_v58  ;;  %788 = vst.msk [vmem:[#allocation2 + $0x1e8] sm:$0xff] %vm19_vm1, %v723_v57  ;;  %v724_v4 = vadd.f32 %v657_v63, %v146_v62  ;;  %v579_v20 = vpop.f32.mrf.mxu1 }
 0x103   :  { %741 = vst.msk [vmem:[#allocation2 + $0x70] sm:$0xff] %vm19_vm1, %v676_v60  ;;  %v677_v5 = vadd.f32 %v539_v2, %v99_v1  ;;  %v693_v31 = vadd.f32 %v579_v20, %v115_v19 }
 0x104   :  { %757 = vst.msk [vmem:[#allocation2 + $0xf0] sm:$0xff] %vm19_vm1, %v692_v0  ;;  %v854_v6 = vld [vmem:[#allocation2 + $0x1e0] sm:$0xff] }
 0x105   :  { %773 = vst.msk [vmem:[#allocation2 + $0x170] sm:$0xff] %vm19_vm1, %v708_v3  ;;  %v922_v7 = vadd.f32 %v1472_v40, %v854_v6 }
 0x106   :  { %v807_v8 = vld [vmem:[#allocation2 + $0x68] sm:$0xff]  ;;  %789 = vst.msk [vmem:[#allocation2 + $0x1f0] sm:$0xff] %vm19_vm1, %v724_v4 }
 0x107   :  { %v875_v9 = vadd.f32 %v1472_v40, %v807_v8  ;;  %v823_v10 = vld [vmem:[#allocation2 + $0xe8] sm:$0xff]  ;;  %742 = vst.msk [vmem:[#allocation2 + $0x78] sm:$0xff] %vm19_vm1, %v677_v5 }
 0x108   :  { %986 = vst.msk [vmem:[%s1893_s3 + $0x1e0] sm:$0xff] %vm19_vm1, %v922_v7  ;;  %v891_v11 = vadd.f32 %v1472_v40, %v823_v10  ;;  %v839_v12 = vld [vmem:[#allocation2 + $0x168] sm:$0xff] }
 0x109   :  { %939 = vst.msk [vmem:[%s1893_s3 + $0x68] sm:$0xff] %vm19_vm1, %v875_v9  ;;  %v907_v13 = vadd.f32 %v1472_v40, %v839_v12  ;;  %v855_v14 = vld [vmem:[#allocation2 + $0x1e8] sm:$0xff]  ;;  %v619_v24 = vpop.f32.mrf.mxu2  ;;  %v659_v28 = vpop.f32.mrf.mxu3 }
 0x10a   :  { %955 = vst.msk [vmem:[%s1893_s3 + $0xe8] sm:$0xff] %vm19_vm1, %v891_v11  ;;  %v923_v15 = vadd.f32 %v1472_v40, %v855_v14  ;;  %v808_v16 = vld [vmem:[#allocation2 + $0x70] sm:$0xff]  ;;  %v709_v33 = vadd.f32 %v619_v24, %v131_v23  ;;  %v725_v34 = vadd.f32 %v659_v28, %v147_v27 }
 0x10b   :  { %971 = vst.msk [vmem:[%s1893_s3 + $0x168] sm:$0xff] %vm19_vm1, %v907_v13  ;;  %v876_v17 = vadd.f32 %v1472_v40, %v808_v16  ;;  %v824_v18 = vld [vmem:[#allocation2 + $0xf0] sm:$0xff] }
 0x10c   :  { %987 = vst.msk [vmem:[%s1893_s3 + $0x1e8] sm:$0xff] %vm19_vm1, %v923_v15  ;;  %v892_v21 = vadd.f32 %v1472_v40, %v824_v18  ;;  %v840_v22 = vld [vmem:[#allocation2 + $0x170] sm:$0xff] }
 0x10d   :  { %940 = vst.msk [vmem:[%s1893_s3 + $0x70] sm:$0xff] %vm19_vm1, %v876_v17  ;;  %v908_v25 = vadd.f32 %v1472_v40, %v840_v22  ;;  %v856_v26 = vld [vmem:[#allocation2 + $0x1f0] sm:$0xff] }
 0x10e   :  { %956 = vst.msk [vmem:[%s1893_s3 + $0xf0] sm:$0xff] %vm19_vm1, %v892_v21  ;;  %v924_v29 = vadd.f32 %v1472_v40, %v856_v26  ;;  %v809_v30 = vld [vmem:[#allocation2 + $0x78] sm:$0xff] }
 0x10f   :  { %972 = vst.msk [vmem:[%s1893_s3 + $0x170] sm:$0xff] %vm19_vm1, %v908_v25  ;;  %v877_v32 = vadd.f32 %v1472_v40, %v809_v30 }
 0x110   :  { %988 = vst.msk [vmem:[%s1893_s3 + $0x1f0] sm:$0xff] %vm19_vm1, %v924_v29 }
 0x111   :  { %941 = vst.msk [vmem:[%s1893_s3 + $0x78] sm:$0xff] %vm19_vm1, %v877_v32 }
 0x112   :  { %758 = vst.msk [vmem:[#allocation2 + $0xf8] sm:$0xff] %vm19_vm1, %v693_v31 }
 0x113   :  { %774 = vst.msk [vmem:[#allocation2 + $0x178] sm:$0xff] %vm19_vm1, %v709_v33 }
 0x114   :  { %790 = vst.msk [vmem:[#allocation2 + $0x1f8] sm:$0xff] %vm19_vm1, %v725_v34 }
 0x119   :  { %v825_v35 = vld [vmem:[#allocation2 + $0xf8] sm:$0xff] }
 0x11a   :  { %v893_v36 = vadd.f32 %v1472_v40, %v825_v35  ;;  %v841_v37 = vld [vmem:[#allocation2 + $0x178] sm:$0xff] }
 0x11b   :  { %v909_v38 = vadd.f32 %v1472_v40, %v841_v37  ;;  %v857_v39 = vld [vmem:[#allocation2 + $0x1f8] sm:$0xff] }
 0x11c   :  { %957 = vst.msk [vmem:[%s1893_s3 + $0xf8] sm:$0xff] %vm19_vm1, %v893_v36  ;;  %v925_v41 = vadd.f32 %v1472_v40, %v857_v39 }
 0x11d   :  { %973 = vst.msk [vmem:[%s1893_s3 + $0x178] sm:$0xff] %vm19_vm1, %v909_v38 }
 0x11e   :  { %989 = vst.msk [vmem:[%s1893_s3 + $0x1f8] sm:$0xff] %vm19_vm1, %v925_v41 }

</bundles_post_ra>
